<compile_context>
chip_gen: v7x
topology: tpu7x:2x2x1
jax: 0.10.0
libtpu: 0.0.40
codegen_flags: <defaults>
</compile_context>

<pallas_src>
import numpy as np
import jax
import jax.numpy as jnp
from jax.experimental import pallas as pl
from jax.experimental.pallas import tpu as pltpu

_LANE = 128
_D_IN_VPU_MAX = 8        # if D_in <= this, layer 1 runs on the VPU (no MXU)


# --------------------------------------------------------------------------
# helpers
# --------------------------------------------------------------------------
def _round_up(x, m):
    return ((x + m - 1) // m) * m


def _num_tensorcores():
    """TensorCores that share the ('parallel',) grid: 1 on v5e/v6e, 2 on v7x.
    Fully defensive: any failure -> 1 (always correct, just no megacore split).
    """
    try:
        info = pltpu.get_tpu_info()
        for attr in ("num_cores", "core_count", "num_tensorcores",
                     "tensorcores_per_chip", "cores_per_chip"):
            v = getattr(info, attr, None)
            if isinstance(v, (int, np.integer)) and int(v) > 0:
                return int(v)
    except Exception:
        pass
    try:
        dev = jax.devices()[0]
        for attr in ("num_cores", "core_count"):
            v = getattr(dev, attr, None)
            if isinstance(v, (int, np.integer)) and int(v) > 0:
                return int(v)
    except Exception:
        pass
    return 1


def _default_tile_m():
    """Conservative tile cap: 512 on v5-class chips (1 vst slot, spill-prone),
    1024 elsewhere (v6e/v7x)."""
    try:
        kind = jax.devices()[0].device_kind.lower()
        if "v5" in kind:
            return 512
    except Exception:
        pass
    return 1024


def _pick_tile_and_pad(N, tile_m, num_cores):
    """Pick a lane-dense tile tm (multiple of 128) and padded batch N_pad such
    that N_pad % tm == 0 and the grid length is a multiple of the TC count.

    Never returns a full-batch block for large ragged N (bounded VMEM), and
    never splits a single-tile batch on single-TC chips.
    """
    cores = max(1, min(int(num_cores), 8))
    n128 = _round_up(N, _LANE)
    cap = max(_LANE, (min(int(tile_m), n128) // _LANE) * _LANE)

    # Prefer the largest tile (>= cap/2) that divides the 128-rounded batch
    # into a whole number of equal steps per core (no padding needed).
    lower = max(_LANE, cap // 2)
    tm = cap
    while tm >= lower:
        if n128 % (tm * cores) == 0:
            return tm, n128
        tm -= _LANE

    # Otherwise keep the big tile and pad so every core gets equal full tiles.
    return cap, _round_up(n128, cap * cores)


# --------------------------------------------------------------------------
# kernel
# --------------------------------------------------------------------------
def _make_kernel(D_in, H, D_out, scale, vpu_l1, vpu_l4):
    def kernel(xT_ref, w1t_ref, b1_ref, w2t_ref, b2_ref,
               w3t_ref, b3_ref, w4_ref, b4_ref, o_ref):
        xT = xT_ref[...].astype(jnp.float32)                   # (D_in, tm)

        def affine(h):
            # scale == n*a1 == 1.0 for the reference module -> elided.
            return h if scale == 1.0 else scale * h

        # ---- layer 1 ----------------------------------------------------
        if vpu_l1:
            # K = D_in is tiny: VPU outer-product accumulate instead of an
            # almost-empty MXU pass. w1t column d (H,1) lane-broadcasts
            # against x row d (1,tm), which is already lane-dense.
            w1t = w1t_ref[...].astype(jnp.float32)             # (H, D_in)
            h = w1t[:, 0:1] * xT[0:1, :]
            for d in range(1, D_in):                           # static unroll
                h = h + w1t[:, d:d + 1] * xT[d:d + 1, :]
            h = h + b1_ref[...]
        else:
            h = jnp.dot(w1t_ref[...], xT,
                        preferred_element_type=jnp.float32) + b1_ref[...]
        y = jnp.tanh(affine(h))                                # (H, tm)

        # ---- layers 2, 3: (H,H) x (H,tm) on the MXU ----------------------
        y = jnp.tanh(affine(
            jnp.dot(w2t_ref[...], y, preferred_element_type=jnp.float32)
            + b2_ref[...]))
        y = jnp.tanh(affine(
            jnp.dot(w3t_ref[...], y, preferred_element_type=jnp.float32)
            + b3_ref[...]))

        # ---- layer 4 ------------------------------------------------------
        if vpu_l4:
            # D_out == 1: elementwise multiply (VPU) + sublane reduce over H
            # (XLU) + scalar bias from SMEM. Avoids the last MXU round-trip.
            w4 = w4_ref[...].astype(jnp.float32)               # (H, 1)
            out = jnp.sum(y * w4, axis=0, keepdims=True) + b4_ref[0]
        else:
            out = jnp.dot(w4_ref[...], y,
                          preferred_element_type=jnp.float32) + b4_ref[...]
        o_ref[...] = affine(out).astype(o_ref.dtype)           # (D_out, tm)
    return kernel


# --------------------------------------------------------------------------
# wrapper
# --------------------------------------------------------------------------
def pack_params(params):
    """One-time repack of the (in, out)-layout params into the kernel layout
    (weights transposed so the batch axis sits on TPU lanes). Call once at
    init/update time rather than per forward call."""
    D_in, H = params["w1"].shape
    D_out = params["w4"].shape[1]
    packed = {
        "w1t": jnp.asarray(params["w1"]).T,                    # (H, D_in)
        "b1": jnp.asarray(params["b1"]).reshape(H, 1),
        "w2t": jnp.asarray(params["w2"]).T,                    # (H, H)
        "b2": jnp.asarray(params["b2"]).reshape(H, 1),
        "w3t": jnp.asarray(params["w3"]).T,                    # (H, H)
        "b3": jnp.asarray(params["b3"]).reshape(H, 1),
    }
    if D_out == 1:
        packed["w4"] = jnp.asarray(params["w4"])               # (H, 1) VPU/XLU
        packed["b4"] = jnp.asarray(params["b4"]).reshape(1)    # SMEM scalar
    else:
        packed["w4"] = jnp.asarray(params["w4"]).T             # (D_out, H) MXU
        packed["b4"] = jnp.asarray(params["b4"]).reshape(D_out, 1)
    return packed


def particular_forward(x, params, *, a1=0.1, tile_m=None, num_cores=None):
    """Pallas TPU forward pass of the `particular` MLP.

    x:      (N, D_in) float32
    params: either the raw dict {w1 (D_in,H), b1 (H,), ...} or a pack_params()
            output (preferred: repack once, reuse across calls).
    """
    n = 1.0 / a1
    scale = float(n * a1)          # == 1.0, kept for semantic fidelity

    packed = params if "w1t" in params else pack_params(params)
    H, D_in = packed["w1t"].shape
    vpu_l4 = packed["b4"].ndim == 1
    D_out = 1 if vpu_l4 else packed["w4"].shape[0]
    vpu_l1 = D_in <= _D_IN_VPU_MAX

    N = x.shape[0]
    if tile_m is None:
        tile_m = _default_tile_m()
    if num_cores is None:
        num_cores = _num_tensorcores()
    tm, N_pad = _pick_tile_and_pad(N, tile_m, num_cores)
    grid = (N_pad // tm,)

    # Single fused wrapper op: transpose (batch -> lanes) + pad to N_pad.
    xT = x.T if N_pad == N else jnp.pad(x.T, ((0, 0), (0, N_pad - N)))

    # Weights / biases are tiny and grid-invariant: constant index_map means
    # Pallas only DMAs them once (block index never changes between steps).
    full2 = lambda shape: pl.BlockSpec(shape, lambda i: (0, 0))

    if vpu_l4:
        w4_spec = full2((H, 1))
        b4_spec = pl.BlockSpec((1,), lambda i: (0,),
                               memory_space=pltpu.MemorySpace.SMEM)
    else:
        w4_spec = full2((D_out, H))
        b4_spec = full2((D_out, 1))

    kernel = _make_kernel(D_in, H, D_out, scale, vpu_l1, vpu_l4)

    flops = 2 * N_pad * (D_in * H + H * H + H * H + H * D_out)
    bytes_accessed = 4 * (N_pad * D_in + N_pad * D_out + D_in * H
                          + 2 * H * H + H * D_out + 3 * H + D_out)

    outT = pl.pallas_call(
        kernel,
        out_shape=jax.ShapeDtypeStruct((D_out, N_pad), x.dtype),
        grid_spec=pltpu.PrefetchScalarGridSpec(
            num_scalar_prefetch=0,
            grid=grid,
            in_specs=[
                pl.BlockSpec((D_in, tm), lambda i: (0, i)),    # xT tile
                full2((H, D_in)), full2((H, 1)),               # linear1
                full2((H, H)),    full2((H, 1)),               # linear2
                full2((H, H)),    full2((H, 1)),               # linear3
                w4_spec,          b4_spec,                     # linear4
            ],
            out_specs=pl.BlockSpec((D_out, tm), lambda i: (0, i)),
        ),
        compiler_params=pltpu.CompilerParams(
            dimension_semantics=("parallel",)),
        cost_estimate=pl.CostEstimate(
            flops=flops,
            transcendentals=3 * N_pad * H,
            bytes_accessed=bytes_accessed),
    )(xT, packed["w1t"], packed["b1"], packed["w2t"], packed["b2"],
      packed["w3t"], packed["b3"], packed["w4"], packed["b4"])

    out = outT if N_pad == N else outT[:, :N]
    if D_out == 1:
        return out.reshape(N, 1)       # (1,N) and (N,1) share memory layout
    return out.T                        # back to (N, D_out)


# --------------------------------------------------------------------------
# init + reference
# --------------------------------------------------------------------------
def init_params(key, D_in, H, D_out):
    """Deterministic init matching the PyTorch module's normal_ inits.
    Weight std = sqrt(2/(fan_in+fan_out)), bias std = 1. Weights stored as
    (in, out) — same distribution as PyTorch's (out, in), transposed."""
    ks = jax.random.split(key, 8)
    return {
        "w1": jax.random.normal(ks[0], (D_in, H), jnp.float32) * np.sqrt(2.0 / (D_in + H)),
        "b1": jax.random.normal(ks[1], (H,), jnp.float32),
        "w2": jax.random.normal(ks[2], (H, H), jnp.float32) * np.sqrt(2.0 / (H + H)),
        "b2": jax.random.normal(ks[3], (H,), jnp.float32),
        "w3": jax.random.normal(ks[4], (H, H), jnp.float32) * np.sqrt(2.0 / (H + H)),
        "b3": jax.random.normal(ks[5], (H,), jnp.float32),
        "w4": jax.random.normal(ks[6], (H, D_out), jnp.float32) * np.sqrt(2.0 / (H + D_out)),
        "b4": jax.random.normal(ks[7], (D_out,), jnp.float32),
    }


def _reference_forward(x, params, a1=0.1):
    n = 1.0 / a1
    s = n * a1
    y1 = jnp.tanh(s * (x @ params["w1"] + params["b1"]))
    y2 = jnp.tanh(s * (y1 @ params["w2"] + params["b2"]))
    y3 = jnp.tanh(s * (y2 @ params["w3"] + params["b3"]))
    return s * (y3 @ params["w4"] + params["b4"])


# --------------------------------------------------------------------------
# main
# --------------------------------------------------------------------------
if __name__ == "__main__":
    # 2-D input coords, hidden width 32, scalar output (crack/CENN usage).
    D_in, H, D_out = 2, 32, 1

    key = jax.random.PRNGKey(0)
    pkey, xkey1, xkey2 = jax.random.split(key, 3)
    params = init_params(pkey, D_in, H, D_out)
    packed = pack_params(params)          # repack weights once

    # Two batch sizes: a ragged one (exercises padding path) and a multi-tile
    # one (exercises the grid / megacore-split path). Coordinates in [-1, 1],
    # mirroring the np.linspace(-1, 1, N_test) grids in the original script.
    for N, xkey in ((300, xkey1), (1024, xkey2)):
        x = jax.random.uniform(xkey, (N, D_in), jnp.float32,
                               minval=-1.0, maxval=1.0)
        y = jax.block_until_ready(particular_forward(x, packed))
        y_ref = _reference_forward(x, params)
        np.testing.assert_allclose(np.asarray(y), np.asarray(y_ref),
                                   rtol=1e-5, atol=1e-5)

    print("KERNEL_OK")
</pallas_src>

<mosaic_0001>
module attributes {stable_mosaic.version = 11 : i64} {
  func.func @kernel(%arg0: i32, %arg1: memref<2x384xf32, #tpu.memory_space<vmem>>, %arg2: memref<32x2xf32, #tpu.memory_space<vmem>>, %arg3: memref<32x1xf32, #tpu.memory_space<vmem>>, %arg4: memref<32x32xf32, #tpu.memory_space<vmem>>, %arg5: memref<32x1xf32, #tpu.memory_space<vmem>>, %arg6: memref<32x32xf32, #tpu.memory_space<vmem>>, %arg7: memref<32x1xf32, #tpu.memory_space<vmem>>, %arg8: memref<32x1xf32, #tpu.memory_space<vmem>>, %arg9: memref<1xf32, #tpu.memory_space<smem>>, %arg10: memref<1x384xf32, #tpu.memory_space<vmem>>) attributes {dimension_semantics = [#tpu.dimension_semantics<parallel>], iteration_bounds = array<i64: 1>, scalar_prefetch = 0 : i64, scratch_operands = 0 : i64, tpu.core_type = #tpu.core_type<tc>, window_params = [{transform_indices = @transform_0, window_bounds = array<i64: 2, 384>}, {pipeline_mode = #tpu.pipeline_mode<synchronous>, transform_indices = @transform_1, window_bounds = array<i64: 32, 2>}, {pipeline_mode = #tpu.pipeline_mode<synchronous>, transform_indices = @transform_2, window_bounds = array<i64: 32, 1>}, {pipeline_mode = #tpu.pipeline_mode<synchronous>, transform_indices = @transform_3, window_bounds = array<i64: 32, 32>}, {pipeline_mode = #tpu.pipeline_mode<synchronous>, transform_indices = @transform_4, window_bounds = array<i64: 32, 1>}, {pipeline_mode = #tpu.pipeline_mode<synchronous>, transform_indices = @transform_5, window_bounds = array<i64: 32, 32>}, {pipeline_mode = #tpu.pipeline_mode<synchronous>, transform_indices = @transform_6, window_bounds = array<i64: 32, 1>}, {pipeline_mode = #tpu.pipeline_mode<synchronous>, transform_indices = @transform_7, window_bounds = array<i64: 32, 1>}, {transform_indices = @transform_8, window_bounds = array<i64: 1>}, {transform_indices = @transform_9, window_bounds = array<i64: 1, 384>}]} {
    %c0 = arith.constant 0 : index
    %c0_0 = arith.constant 0 : index
    %0 = vector.load %arg1[%c0, %c0_0] : memref<2x384xf32, #tpu.memory_space<vmem>>, vector<2x384xf32>
    %c0_1 = arith.constant 0 : index
    %c0_2 = arith.constant 0 : index
    %1 = vector.load %arg2[%c0_1, %c0_2] : memref<32x2xf32, #tpu.memory_space<vmem>>, vector<32x2xf32>
    %2 = vector.extract_strided_slice %1 {offsets = [0, 0], sizes = [32, 1], strides = [1, 1]} : vector<32x2xf32> to vector<32x1xf32>
    %3 = vector.extract_strided_slice %0 {offsets = [0, 0], sizes = [1, 384], strides = [1, 1]} : vector<2x384xf32> to vector<1x384xf32>
    %4 = vector.broadcast %2 : vector<32x1xf32> to vector<32x384xf32>
    %5 = vector.broadcast %3 : vector<1x384xf32> to vector<32x384xf32>
    %6 = arith.mulf %4, %5 : vector<32x384xf32>
    %7 = vector.extract_strided_slice %1 {offsets = [0, 1], sizes = [32, 1], strides = [1, 1]} : vector<32x2xf32> to vector<32x1xf32>
    %8 = vector.extract_strided_slice %0 {offsets = [1, 0], sizes = [1, 384], strides = [1, 1]} : vector<2x384xf32> to vector<1x384xf32>
    %9 = vector.broadcast %7 : vector<32x1xf32> to vector<32x384xf32>
    %10 = vector.broadcast %8 : vector<1x384xf32> to vector<32x384xf32>
    %11 = arith.mulf %9, %10 : vector<32x384xf32>
    %12 = arith.addf %6, %11 : vector<32x384xf32>
    %c0_3 = arith.constant 0 : index
    %c0_4 = arith.constant 0 : index
    %13 = vector.load %arg3[%c0_3, %c0_4] : memref<32x1xf32, #tpu.memory_space<vmem>>, vector<32x1xf32>
    %14 = vector.broadcast %13 : vector<32x1xf32> to vector<32x384xf32>
    %15 = arith.addf %12, %14 : vector<32x384xf32>
    %16 = math.tanh %15 : vector<32x384xf32>
    %c0_5 = arith.constant 0 : index
    %c0_6 = arith.constant 0 : index
    %17 = vector.load %arg4[%c0_5, %c0_6] : memref<32x32xf32, #tpu.memory_space<vmem>>, vector<32x32xf32>
    %cst = arith.constant dense<0.000000e+00> : vector<32x384xf32>
    %18 = tpu.matmul %17, %16, %cst {dimension_numbers = #tpu.dot_dimension_numbers<[1], [0], [0], [1], [0, 0, 1, 1], [], []>} : vector<32x32xf32>, vector<32x384xf32>, vector<32x384xf32> -> vector<32x384xf32>
    %c0_7 = arith.constant 0 : index
    %c0_8 = arith.constant 0 : index
    %19 = vector.load %arg5[%c0_7, %c0_8] : memref<32x1xf32, #tpu.memory_space<vmem>>, vector<32x1xf32>
    %20 = vector.broadcast %19 : vector<32x1xf32> to vector<32x384xf32>
    %21 = arith.addf %18, %20 : vector<32x384xf32>
    %22 = math.tanh %21 : vector<32x384xf32>
    %c0_9 = arith.constant 0 : index
    %c0_10 = arith.constant 0 : index
    %23 = vector.load %arg6[%c0_9, %c0_10] : memref<32x32xf32, #tpu.memory_space<vmem>>, vector<32x32xf32>
    %cst_11 = arith.constant dense<0.000000e+00> : vector<32x384xf32>
    %24 = tpu.matmul %23, %22, %cst_11 {dimension_numbers = #tpu.dot_dimension_numbers<[1], [0], [0], [1], [0, 0, 1, 1], [], []>} : vector<32x32xf32>, vector<32x384xf32>, vector<32x384xf32> -> vector<32x384xf32>
    %c0_12 = arith.constant 0 : index
    %c0_13 = arith.constant 0 : index
    %25 = vector.load %arg7[%c0_12, %c0_13] : memref<32x1xf32, #tpu.memory_space<vmem>>, vector<32x1xf32>
    %26 = vector.broadcast %25 : vector<32x1xf32> to vector<32x384xf32>
    %27 = arith.addf %24, %26 : vector<32x384xf32>
    %28 = math.tanh %27 : vector<32x384xf32>
    %c0_14 = arith.constant 0 : index
    %c0_15 = arith.constant 0 : index
    %29 = vector.load %arg8[%c0_14, %c0_15] : memref<32x1xf32, #tpu.memory_space<vmem>>, vector<32x1xf32>
    %30 = vector.broadcast %29 : vector<32x1xf32> to vector<32x384xf32>
    %31 = arith.mulf %28, %30 : vector<32x384xf32>
    %cst_16 = arith.constant dense<0.000000e+00> : vector<384xf32>
    %32 = vector.multi_reduction <add>, %31, %cst_16 [0] : vector<32x384xf32> to vector<384xf32>
    %33 = vector.shape_cast %32 : vector<384xf32> to vector<1x384xf32>
    %c0_17 = arith.constant 0 : index
    %34 = memref.load %arg9[%c0_17] : memref<1xf32, #tpu.memory_space<smem>>
    %35 = vector.broadcast %34 : f32 to vector<1x384xf32>
    %36 = arith.addf %33, %35 : vector<1x384xf32>
    %c0_18 = arith.constant 0 : index
    %c0_19 = arith.constant 0 : index
    %37 = vector.load %arg10[%c0_18, %c0_19] : memref<1x384xf32, #tpu.memory_space<vmem>>, vector<1x384xf32>
    tpu.vector_store %arg10[%c0_18, %c0_19], %36 {strides = array<i32>} : memref<1x384xf32, #tpu.memory_space<vmem>>, vector<1x384xf32>,
    return
  }
  func.func @transform_0(%arg0: i32) -> (i32, i32) {
    %c0_i32 = arith.constant 0 : i32
    %c0_i32_0 = arith.constant 0 : i32
    return %c0_i32, %arg0 : i32, i32
  }
  func.func @transform_1(%arg0: i32) -> (i32, i32) {
    %c0_i32 = arith.constant 0 : i32
    %c0_i32_0 = arith.constant 0 : i32
    %c0_i32_1 = arith.constant 0 : i32
    return %c0_i32, %c0_i32_0 : i32, i32
  }
  func.func @transform_2(%arg0: i32) -> (i32, i32) {
    %c0_i32 = arith.constant 0 : i32
    %c0_i32_0 = arith.constant 0 : i32
    %c0_i32_1 = arith.constant 0 : i32
    return %c0_i32, %c0_i32_0 : i32, i32
  }
  func.func @transform_3(%arg0: i32) -> (i32, i32) {
    %c0_i32 = arith.constant 0 : i32
    %c0_i32_0 = arith.constant 0 : i32
    %c0_i32_1 = arith.constant 0 : i32
    return %c0_i32, %c0_i32_0 : i32, i32
  }
  func.func @transform_4(%arg0: i32) -> (i32, i32) {
    %c0_i32 = arith.constant 0 : i32
    %c0_i32_0 = arith.constant 0 : i32
    %c0_i32_1 = arith.constant 0 : i32
    return %c0_i32, %c0_i32_0 : i32, i32
  }
  func.func @transform_5(%arg0: i32) -> (i32, i32) {
    %c0_i32 = arith.constant 0 : i32
    %c0_i32_0 = arith.constant 0 : i32
    %c0_i32_1 = arith.constant 0 : i32
    return %c0_i32, %c0_i32_0 : i32, i32
  }
  func.func @transform_6(%arg0: i32) -> (i32, i32) {
    %c0_i32 = arith.constant 0 : i32
    %c0_i32_0 = arith.constant 0 : i32
    %c0_i32_1 = arith.constant 0 : i32
    return %c0_i32, %c0_i32_0 : i32, i32
  }
  func.func @transform_7(%arg0: i32) -> (i32, i32) {
    %c0_i32 = arith.constant 0 : i32
    %c0_i32_0 = arith.constant 0 : i32
    %c0_i32_1 = arith.constant 0 : i32
    return %c0_i32, %c0_i32_0 : i32, i32
  }
  func.func @transform_8(%arg0: i32) -> i32 {
    %c0_i32 = arith.constant 0 : i32
    %c0_i32_0 = arith.constant 0 : i32
    return %c0_i32 : i32
  }
  func.func @transform_9(%arg0: i32) -> (i32, i32) {
    %c0_i32 = arith.constant 0 : i32
    %c0_i32_0 = arith.constant 0 : i32
    return %c0_i32, %arg0 : i32, i32
  }
}

</mosaic_0001>

<bundles_post_ra>
// kernel: tpu_custom_call.1
= control target key start
LH: loop header
LB: loop body
LE: loop exit
PB: predicated region body
PF: predicated region fallthrough
CT: control target
= control target key end

     0   :  { %v980_v2 = vmov 1   ;;  %v981_v4 = vmov 0   ;;  %s1180_s0 = inlined_call_operand.vmem [shape: f32[2,384], index: 0, kind: input, shape index: {}]   ;;  %s1181_s1 = inlined_call_operand.vmem [shape: f32[32,2], index: 1, kind: input, shape index: {}]   ;;  %s1182_s2 = inlined_call_operand.vmem [shape: f32[32,1], index: 2, kind: input, shape index: {}]   ;;  %s1183_s3 = inlined_call_operand.vmem [shape: f32[32,32], index: 3, kind: input, shape index: {}]   ;;  %s1184_s4 = inlined_call_operand.vmem [shape: f32[32,1], index: 4, kind: input, shape index: {}]   ;;  %s1185_s5 = inlined_call_operand.vmem [shape: f32[32,32], index: 5, kind: input, shape index: {}]   ;;  %s1186_s6 = inlined_call_operand.vmem [shape: f32[32,1], index: 6, kind: input, shape index: {}]   ;;  %s1187_s7 = inlined_call_operand.vmem [shape: f32[32,1], index: 7, kind: input, shape index: {}]   ;;  %s1188_s8 = inlined_call_operand.<no memory space> [shape: f32[1], index: 8, kind: input, shape index: {}]   ;;  %s1189_s9 = inlined_call_operand.hbm [shape: f32[1,384], index: 9, kind: output, shape index: {}]  }
   0x1   :  { %v37_v0 = vld [vmem:[%s1181_s1 + $0x10] sm:$0xff]  ;;  %v35_v1 = vld [vmem:[%s1181_s1] sm:$0xff]  ;;  %880 = vset.pattern.permute.xlu0 %v980_v2  ;;  %878 = vset.pattern.permute.xlu1 %v980_v2  ;;  %v36_v3 = vld [vmem:[%s1181_s1 + $0x8] sm:$0xff] }
   0x2   :  { %108 = vperm.xlu0 %880, %v37_v0   ;;  %100 = vperm.xlu1 %878, %v35_v1  }
   0x6   :  { %881 = vset.pattern.permute.xlu0 %v981_v4  ;;  %104 = vperm.xlu1 %878, %v36_v3  }
   0x7   :  { %41 = vperm.xlu0 %881, %v35_v1  }
   0x8   :  { %15 = vsyncpa [#allocation4], 0  ;;  %v38_v5 = vld [vmem:[%s1181_s1 + $0x18] sm:$0xff]  ;;  %v167_v6 = vld [vmem:[%s1182_s2 + $0x8] sm:$0xff]  ;;  %vm242_vm0 = vcmask 261120   ;;  %v982_v22 = vmov 0.0   ;;  %v60_v24 = vlaneseq }
   0x9   :  { %v166_v7 = vld [vmem:[%s1182_s2] sm:$0xff]  ;;  %v168_v9 = vld [vmem:[%s1182_s2 + $0x10] sm:$0xff]  ;;  %v169_v11 = vld [vmem:[%s1182_s2 + $0x18] sm:$0xff]  ;;  %319 = vmatprep.mubr.f32.mxu0 %v982_v22  ;;  %s984_s17 = smov [#allocation3]  }
   0xa   :  { %879 = vset.pattern.permute.xlu1 %v981_v4  ;;  %v218_v8 = vld [vmem:[%s1184_s4] sm:$0xff]  ;;  %v220_v10 = vld [vmem:[%s1184_s4 + $0x10] sm:$0xff]  ;;  %v219_v13 = vld [vmem:[%s1184_s4 + $0x8] sm:$0xff]  ;;  %v1104_v25 = vshrl.u32 %v60_v24, 7  ;;  %s773_s18 = sshll.u32 %s984_s17, 4  ;;  %vm764_vm1 = vcmp.lt.s32.totalorder %v60_v24, 384  ;;  %s774_s18 = int_to_ptr.vmem [resolvable:$true] %s773_s18 }
   0xb   :  { %46 = vperm.xlu0 %881, %v36_v3   ;;  %56 = vperm.xlu1 %879, %v38_v5   ;;  %v445_v12 = vld [vmem:[%s1186_s6] sm:$0xff]  ;;  %v447_v14 = vld [vmem:[%s1186_s6 + $0x10] sm:$0xff]  ;;  %v221_v15 = vld [vmem:[%s1184_s4 + $0x18] sm:$0xff]  ;;  %s956_s19 = scalar_lea.vmem %s774_s18, 48  ;;  %p961_p1 = scmp.lt.s32.totalorder %s774_s18, %s774_s18 }
   0xc   :  { %v667_v16 = vld [vmem:[%s1187_s7] sm:$0xff]  ;;  %v446_v17 = vld [vmem:[%s1186_s6 + $0x8] sm:$0xff]  ;;  %v669_v18 = vld [vmem:[%s1187_s7 + $0x10] sm:$0xff]  ;;  %v62_v28 = vsub.s32 0, %v1104_v25  ;;  %v66_v29 = vsub.s32 2, %v1104_v25  ;;  %v70_v30 = vsub.s32 4, %v1104_v25  ;;  %p957_p0 = scmp.ne.s32.totalorder %s774_s18, %s956_s19 }
   0xd   :  { %v448_v19 = vld [vmem:[%s1186_s6 + $0x18] sm:$0xff]  ;;  %v668_v20 = vld [vmem:[%s1187_s7 + $0x8] sm:$0xff]  ;;  %v1095_v21 = vld [vmem:[%s1183_s3] sm:$0xff]  ;;  %v117_v31 = vsub.s32 1, %v1104_v25  ;;  %v121_v32 = vsub.s32 3, %v1104_v25  ;;  %v125_v33 = vsub.s32 5, %v1104_v25 }
   0xe   :  { %821 = vmatprep.mubr.msk.f32.mxu1 %vm242_vm0, %v1095_v21  ;;  %v670_v23 = vld [vmem:[%s1187_s7 + $0x18] sm:$0xff]  ;;  %v34_v34 = vld [vmem:[%s1180_s0] sm:$0x3f] }
   0xf   :  { %51 = vperm.xlu0 %881, %v37_v0   ;;  %882 = vset.pattern.permute.xlu1 %v980_v2  ;;  %v63_v37 = vrot.slane %v34_v34, %v62_v28  ;;  %v67_v38 = vrot.slane %v34_v34, %v66_v29  ;;  %v71_v39 = vrot.slane %v34_v34, %v70_v30 }
  0x10   :  { %112 = vperm.xlu1 %882, %v38_v5   ;;  %v118_v40 = vrot.slane %v34_v34, %v117_v31  ;;  %v122_v41 = vrot.slane %v34_v34, %v121_v32  ;;  %v126_v42 = vrot.slane %v34_v34, %v125_v33 }
  0x11   :  { %v78_v43 = vrot.slane %v63_v37, %v62_v28  ;;  %v82_v44 = vrot.slane %v67_v38, %v62_v28  ;;  %v86_v47 = vrot.slane %v71_v39, %v62_v28 }
  0x12   :  { %v133_v48 = vrot.slane %v118_v40, %v117_v31  ;;  %v137_v49 = vrot.slane %v122_v41, %v117_v31  ;;  %v141_v50 = vrot.slane %v126_v42, %v117_v31 }
  0x13   :  { %177 = vperm.xlu0 %881, %v167_v6  }
  0x14   :  { %883 = vset.pattern.permute.xlu1 %v981_v4 }
  0x15   :  { %172 = vperm.xlu1 %883, %v166_v7  }
  0x17   :  { %224 = vperm.xlu0 %881, %v218_v8  }
  0x19   :  { %182 = vperm.xlu1 %883, %v168_v9  }
  0x1b   :  { %234 = vperm.xlu0 %881, %v220_v10  }
  0x1d   :  { %187 = vperm.xlu1 %883, %v169_v11  }
  0x1f   :  { %451 = vperm.xlu0 %881, %v445_v12  }
  0x21   :  { %229 = vperm.xlu1 %883, %v219_v13  }
  0x23   :  { %461 = vperm.xlu0 %881, %v447_v14  }
  0x25   :  { %239 = vperm.xlu1 %883, %v221_v15  }
  0x27   :  { %673 = vperm.xlu0 %881, %v667_v16  }
  0x29   :  { %456 = vperm.xlu1 %883, %v446_v17  }
  0x2b   :  { %683 = vperm.xlu0 %881, %v669_v18  }
  0x2d   :  { %466 = vperm.xlu1 %883, %v448_v19  }
  0x31   :  { %678 = vperm.xlu1 %883, %v668_v20  }
  0x35   :  { %688 = vperm.xlu1 %883, %v670_v23  }
  0x81   :  { %v101_v26 = vpop.permute.xlu1 %100  ;;  %v109_v27 = vpop.permute.xlu0 %108 }
  0x82   :  { %v142_v61 = vmul.f32 %v133_v48, %v101_v26  ;;  %v143_v62 = vmul.f32 %v137_v49, %v101_v26  ;;  %v144_v3 = vmul.f32 %v141_v50, %v101_v26  ;;  %v148_v12 = vmul.f32 %v133_v48, %v109_v27 }
  0x83   :  { %v149_v13 = vmul.f32 %v137_v49, %v109_v27  ;;  %v150_v17 = vmul.f32 %v141_v50, %v109_v27 }
  0x85   :  { %v105_v35 = vpop.permute.xlu1 %104 }
  0x86   :  { %v42_v36 = vpop.permute.xlu0 %41  ;;  %v145_v57 = vmul.f32 %v133_v48, %v105_v35  ;;  %v146_v58 = vmul.f32 %v137_v49, %v105_v35  ;;  %v147_v59 = vmul.f32 %v141_v50, %v105_v35 }
  0x87   :  { %v87_v54 = vmul.f32 %v78_v43, %v42_v36  ;;  %v88_v55 = vmul.f32 %v82_v44, %v42_v36  ;;  %v89_v63 = vmul.f32 %v86_v47, %v42_v36 }
  0x89   :  { %v154_v6 = vadd.f32 %v142_v61, %v87_v54  ;;  %v155_v7 = vadd.f32 %v143_v62, %v88_v55  ;;  %v156_v16 = vadd.f32 %v144_v3, %v89_v63  ;;  %v215_v63 = vld [vmem:[%s1183_s3 + $0x8] sm:$0xff] }
  0x8a   :  { %v47_v45 = vpop.permute.xlu0 %46  ;;  %v57_v46 = vpop.permute.xlu1 %56 }
  0x8b   :  { %v90_v51 = vmul.f32 %v78_v43, %v47_v45  ;;  %v91_v52 = vmul.f32 %v82_v44, %v47_v45  ;;  %v92_v53 = vmul.f32 %v86_v47, %v47_v45  ;;  %v96_v31 = vmul.f32 %v78_v43, %v57_v46 }
  0x8c   :  { %v97_v32 = vmul.f32 %v82_v44, %v57_v46  ;;  %v98_v35 = vmul.f32 %v86_v47, %v57_v46 }
  0x8d   :  { %v157_v0 = vadd.f32 %v145_v57, %v90_v51  ;;  %v158_v1 = vadd.f32 %v146_v58, %v91_v52  ;;  %v159_v2 = vadd.f32 %v147_v59, %v92_v53 }
  0x8e   :  { %v52_v56 = vpop.permute.xlu0 %51 }
  0x8f   :  { %v113_v60 = vpop.permute.xlu1 %112  ;;  %v93_v4 = vmul.f32 %v78_v43, %v52_v56  ;;  %v94_v8 = vmul.f32 %v82_v44, %v52_v56  ;;  %v95_v14 = vmul.f32 %v86_v47, %v52_v56 }
  0x90   :  { %v151_v20 = vmul.f32 %v133_v48, %v113_v60  ;;  %v152_v23 = vmul.f32 %v137_v49, %v113_v60  ;;  %v153_v28 = vmul.f32 %v141_v50, %v113_v60 }
  0x91   :  { %v160_v29 = vadd.f32 %v148_v12, %v93_v4  ;;  %v161_v30 = vadd.f32 %v149_v13, %v94_v8  ;;  %v162_v34 = vadd.f32 %v150_v17, %v95_v14 }
  0x92   :  { %v178_v5 = vpop.permute.xlu0 %177  ;;  %v163_v38 = vadd.f32 %v151_v20, %v96_v31  ;;  %v164_v39 = vadd.f32 %v152_v23, %v97_v32  ;;  %v165_v40 = vadd.f32 %v153_v28, %v98_v35 }
  0x93   :  { %v193_v9 = vadd.f32 %v178_v5, %v157_v0  ;;  %v194_v10 = vadd.f32 %v178_v5, %v158_v1  ;;  %v195_v11 = vadd.f32 %v178_v5, %v159_v2  ;;  %v216_v0 = vld [vmem:[%s1183_s3 + $0x10] sm:$0xff]  ;;  %v217_v1 = vld [vmem:[%s1183_s3 + $0x18] sm:$0xff] }
  0x94   :  { %v173_v15 = vpop.permute.xlu1 %172 }
  0x95   :  { %884 = vtanh.f32 %v193_v9  ;;  %v190_v18 = vadd.f32 %v173_v15, %v154_v6  ;;  %v191_v19 = vadd.f32 %v173_v15, %v155_v7  ;;  %v192_v26 = vadd.f32 %v173_v15, %v156_v16 }
  0x96   :  { %886 = vtanh.f32 %v194_v10  ;;  %v225_v3 = vpop.permute.xlu0 %224 }
  0x97   :  { %888 = vtanh.f32 %v195_v11 }
  0x98   :  { %890 = vtanh.f32 %v190_v18  ;;  %v183_v33 = vpop.permute.xlu1 %182 }
  0x99   :  { %892 = vtanh.f32 %v191_v19  ;;  %v196_v36 = vadd.f32 %v183_v33, %v160_v29  ;;  %v197_v27 = vadd.f32 %v183_v33, %v161_v30  ;;  %v198_v37 = vadd.f32 %v183_v33, %v162_v34 }
  0x9a   :  { %894 = vtanh.f32 %v192_v26  ;;  %v235_v17 = vpop.permute.xlu0 %234 }
  0x9b   :  { %896 = vtanh.f32 %v196_v36 }
  0x9c   :  { %v188_v41 = vpop.permute.xlu1 %187  ;;  %898 = vtanh.f32 %v197_v27 }
  0x9d   :  { %v199_v42 = vadd.f32 %v188_v41, %v163_v38  ;;  %v200_v45 = vadd.f32 %v188_v41, %v164_v39  ;;  %v201_v48 = vadd.f32 %v188_v41, %v165_v40  ;;  %900 = vtanh.f32 %v198_v37 }
  0x9f   :  { %v885_v43 = vpop.eup %884  ;;  %902 = vtanh.f32 %v199_v42 }
  0xa0   :  { %v887_v44 = vpop.eup %886  ;;  %904 = vtanh.f32 %v200_v45  ;;  %v230_v2 = vpop.permute.xlu1 %229 }
  0xa1   :  { %v889_v46 = vpop.eup %888  ;;  %906 = vtanh.f32 %v201_v48 }
  0xa2   :  { %v891_v47 = vpop.eup %890 }
  0xa3   :  { %v893_v49 = vpop.eup %892  ;;  %v843_v50 = vpack.c.bf16 %v885_v43, %v891_v47  ;;  %v442_v47 = vld [vmem:[%s1185_s5 + $0x8] sm:$0xff] }
  0xa4   :  { %v895_v51 = vpop.eup %894  ;;  %v841_v52 = vpack.c.bf16 %v887_v44, %v893_v49  ;;  %v240_v12 = vpop.permute.xlu1 %239 }
  0xa5   :  { %v849_v53 = vpack.c.bf16 %v889_v46, %v895_v51  ;;  %v897_v54 = vpop.eup %896 }
  0xa6   :  { %842 = vmatprep.subr.bf16.mxu0 %v841_v52  ;;  %v899_v55 = vpop.eup %898 }
  0xa7   :  { %850 = vmatprep.subr.bf16.mxu1 %v849_v53  ;;  %844 = vmatpush1.bf16.msra.mxu0 %v843_v50  ;;  %v901_v56 = vpop.eup %900  ;;  %v443_v50 = vld [vmem:[%s1185_s5 + $0x10] sm:$0xff] }
  0xa8   :  { %852 = vmatpush3.bf16.msra.mxu1 %v849_v53 }
  0xa9   :  { %v903_v57 = vpop.eup %902 }
  0xaa   :  { %v905_v58 = vpop.eup %904  ;;  %v847_v59 = vpack.c.bf16 %v903_v57, %v897_v54  ;;  %v444_v54 = vld [vmem:[%s1185_s5 + $0x18] sm:$0xff] }
  0xab   :  { %v907_v60 = vpop.eup %906  ;;  %v845_v61 = vpack.c.bf16 %v905_v58, %v899_v55  ;;  %v457_v55 = vpop.permute.xlu1 %456 }
  0xac   :  { %v853_v62 = vpack.c.bf16 %v907_v60, %v901_v56  ;;  %v452_v56 = vpop.permute.xlu0 %451 }
  0xad   :  { %846 = vmatprep.subr.bf16.mxu0 %v845_v61 }
  0xae   :  { %854 = vmatprep.subr.bf16.mxu1 %v853_v62  ;;  %848 = vmatpush1.bf16.msra.mxu0 %v847_v59 }
  0xaf   :  { %856 = vmatpush3.bf16.msra.mxu1 %v853_v62  ;;  %v467_v61 = vpop.permute.xlu1 %466 }
  0xb1   :  { %781 = vmatmul.mubr.msk.f32.vlgmr.msra.gmra.mrb[0].mxu0 %vm242_vm0, %v1095_v21  ;;  %v1139_v21 = vld [vmem:[%s1185_s5] sm:$0xff] }
  0xb2   :  { %822 = vmatmul.mubr.msk.f32.vlgmr.msra.gmra.mrb[0].mxu1 %vm242_vm0, %v215_v63  ;;  %325 = vmatprep.mubr.f32.mxu0 %v982_v22 }
  0xb3   :  { %824 = vmatprep.mubr.msk.f32.mxu1 %vm242_vm0, %v216_v0 }
  0xb5   :  { %782 = vmatmul.mubr.msk.f32.gmra.mrb[2].mxu0 %vm242_vm0, %v215_v63  ;;  %v462_v63 = vpop.permute.xlu0 %461 }
  0xb6   :  { %825 = vmatmul.mubr.msk.f32.gmra.mrb[2].mxu1 %vm242_vm0, %v217_v1  ;;  %331 = vmatprep.mubr.f32.mxu0 %v982_v22 }
  0xb7   :  { %545 = vmatprep.mubr.f32.mxu1 %v982_v22 }
  0xb9   :  { %783 = vmatmul.mubr.msk.f32.gmra.mrb[4].mxu0 %vm242_vm0, %v216_v0 }
  0xba   :  { %337 = vmatprep.mubr.f32.mxu0 %v982_v22 }
  0xbd   :  { %784 = vmatmul.mubr.msk.f32.gmra.mrb[6].mxu0 %vm242_vm0, %v217_v1 }
  0xbe   :  { %835 = vmatprep.mubr.msk.f32.mxu0 %vm242_vm0, %v1139_v21 }
 0x184   :  { %v321_v4 = vpop.f32.mrb[0].mxu0 }
 0x185   :  { %v322_v5 = vadd.f32 %v321_v4, %v225_v3  ;;  %v823_v6 = vpop.f32.mrb[0].mxu1  ;;  %v323_v7 = vpop.f32.mrb[1].mxu0 }
 0x186   :  { %v416_v8 = vadd.f32 %v823_v6, %v230_v2  ;;  %v324_v9 = vadd.f32 %v323_v7, %v225_v3  ;;  %v410_v10 = vpop.f32.mrb[1].mxu1 }
 0x187   :  { %908 = vtanh.f32 %v322_v5  ;;  %v411_v11 = vadd.f32 %v410_v10, %v225_v3 }
 0x188   :  { %910 = vtanh.f32 %v416_v8  ;;  %v327_v13 = vpop.f32.mrb[2].mxu0  ;;  %v674_v8 = vpop.permute.xlu0 %673 }
 0x189   :  { %912 = vtanh.f32 %v324_v9  ;;  %v328_v14 = vadd.f32 %v327_v13, %v230_v2  ;;  %v826_v15 = vpop.f32.mrb[2].mxu1  ;;  %v329_v16 = vpop.f32.mrb[3].mxu0 }
 0x18a   :  { %914 = vtanh.f32 %v411_v11  ;;  %v426_v18 = vadd.f32 %v826_v15, %v240_v12  ;;  %v330_v19 = vadd.f32 %v329_v16, %v230_v2  ;;  %v420_v20 = vpop.f32.mrb[3].mxu1  ;;  %v679_v11 = vpop.permute.xlu1 %678 }
 0x18b   :  { %916 = vtanh.f32 %v328_v14  ;;  %v421_v23 = vadd.f32 %v420_v20, %v235_v17 }
 0x18c   :  { %918 = vtanh.f32 %v426_v18  ;;  %v333_v26 = vpop.f32.mrb[4].mxu0 }
 0x18d   :  { %920 = vtanh.f32 %v330_v19  ;;  %v334_v28 = vadd.f32 %v333_v26, %v235_v17  ;;  %v335_v29 = vpop.f32.mrb[5].mxu0  ;;  %v684_v26 = vpop.permute.xlu0 %683 }
 0x18e   :  { %922 = vtanh.f32 %v421_v23  ;;  %v336_v30 = vadd.f32 %v335_v29, %v235_v17 }
 0x18f   :  { %924 = vtanh.f32 %v334_v28 }
 0x190   :  { %v339_v31 = vpop.f32.mrb[6].mxu0  ;;  %926 = vtanh.f32 %v336_v30 }
 0x191   :  { %v909_v32 = vpop.eup %908  ;;  %v340_v33 = vadd.f32 %v339_v31, %v240_v12  ;;  %v341_v34 = vpop.f32.mrb[7].mxu0 }
 0x192   :  { %v911_v35 = vpop.eup %910  ;;  %v342_v36 = vadd.f32 %v341_v34, %v240_v12 }
 0x193   :  { %v913_v27 = vpop.eup %912  ;;  %928 = vtanh.f32 %v340_v33 }
 0x194   :  { %v915_v37 = vpop.eup %914  ;;  %930 = vtanh.f32 %v342_v36 }
 0x195   :  { %v917_v38 = vpop.eup %916  ;;  %v865_v39 = vpack.c.bf16 %v911_v35, %v915_v37 }
 0x196   :  { %v919_v40 = vpop.eup %918  ;;  %v859_v41 = vpack.c.bf16 %v917_v38, %v909_v32  ;;  %v689_v32 = vpop.permute.xlu1 %688 }
 0x197   :  { %v921_v42 = vpop.eup %920  ;;  %866 = vmatprep.subr.bf16.mxu0 %v865_v39 }
 0x198   :  { %v923_v45 = vpop.eup %922  ;;  %868 = vmatpush3.bf16.msra.mxu0 %v865_v39  ;;  %v857_v48 = vpack.c.bf16 %v921_v42, %v913_v27 }
 0x199   :  { %v869_v43 = vpack.c.bf16 %v919_v40, %v923_v45  ;;  %v925_v44 = vpop.eup %924 }
 0x19a   :  { %858 = vmatprep.subr.bf16.mxu1 %v857_v48  ;;  %v927_v46 = vpop.eup %926 }
 0x19b   :  { %870 = vmatprep.subr.bf16.mxu0 %v869_v43  ;;  %860 = vmatpush1.bf16.msra.mxu1 %v859_v41 }
 0x19c   :  { %872 = vmatpush3.bf16.msra.mxu0 %v869_v43 }
 0x19d   :  { %v929_v49 = vpop.eup %928 }
 0x19e   :  { %v931_v51 = vpop.eup %930  ;;  %v863_v52 = vpack.c.bf16 %v929_v49, %v925_v44 }
 0x19f   :  { %836 = vmatmul.mubr.msk.f32.vlgmr.msra.gmra.mrb[8].mxu0 %vm242_vm0, %v442_v47  ;;  %v861_v53 = vpack.c.bf16 %v931_v51, %v927_v46 }
 0x1a0   :  { %838 = vmatprep.mubr.msk.f32.mxu0 %vm242_vm0, %v443_v50 }
 0x1a1   :  { %862 = vmatprep.subr.bf16.mxu1 %v861_v53 }
 0x1a2   :  { %864 = vmatpush1.bf16.msra.mxu1 %v863_v52 }
 0x1a3   :  { %839 = vmatmul.mubr.msk.f32.gmra.mrb[10].mxu0 %vm242_vm0, %v444_v54 }
 0x1a5   :  { %789 = vmatmul.mubr.msk.f32.vlgmr.msra.gmra.mrb[4].mxu1 %vm242_vm0, %v1139_v21 }
 0x1a6   :  { %551 = vmatprep.mubr.f32.mxu1 %v982_v22 }
 0x1a9   :  { %790 = vmatmul.mubr.msk.f32.gmra.mrb[6].mxu1 %vm242_vm0, %v442_v47 }
 0x1aa   :  { %557 = vmatprep.mubr.f32.mxu1 %v982_v22 }
 0x1ad   :  { %791 = vmatmul.mubr.msk.f32.gmra.mrb[8].mxu1 %vm242_vm0, %v443_v50 }
 0x1ae   :  { %563 = vmatprep.mubr.f32.mxu1 %v982_v22 }
 0x1b1   :  { %792 = vmatmul.mubr.msk.f32.gmra.mrb[10].mxu1 %vm242_vm0, %v444_v54 }
 0x272   :  { %v837_v57 = vpop.f32.mrb[8].mxu0 }
 0x273   :  { %v642_v58 = vadd.f32 %v837_v57, %v457_v55  ;;  %v636_v59 = vpop.f32.mrb[9].mxu0 }
 0x274   :  { %v637_v60 = vadd.f32 %v636_v59, %v452_v56 }
 0x275   :  { %932 = vtanh.f32 %v642_v58 }
 0x276   :  { %934 = vtanh.f32 %v637_v60  ;;  %v840_v62 = vpop.f32.mrb[10].mxu0 }
 0x277   :  { %v652_v0 = vadd.f32 %v840_v62, %v467_v61  ;;  %v646_v1 = vpop.f32.mrb[11].mxu0 }
 0x278   :  { %v647_v21 = vadd.f32 %v646_v1, %v462_v63  ;;  %v547_v2 = vpop.f32.mrb[4].mxu1 }
 0x279   :  { %936 = vtanh.f32 %v652_v0  ;;  %v548_v3 = vadd.f32 %v547_v2, %v452_v56  ;;  %v549_v22 = vpop.f32.mrb[5].mxu1 }
 0x27a   :  { %938 = vtanh.f32 %v647_v21  ;;  %v550_v4 = vadd.f32 %v549_v22, %v452_v56  ;;  %v983_v22 = vmov 1966171168  }
 0x27b   :  { %940 = vtanh.f32 %v548_v3 }
 0x27c   :  { %v553_v5 = vpop.f32.mrb[6].mxu1  ;;  %942 = vtanh.f32 %v550_v4  ;;  %v740_v4 = vunpack.c.l.s4 %v983_v22 }
 0x27d   :  { %v554_v6 = vadd.f32 %v553_v5, %v457_v55  ;;  %v555_v7 = vpop.f32.mrb[7].mxu1 }
 0x27e   :  { %v556_v9 = vadd.f32 %v555_v7, %v457_v55 }
 0x27f   :  { %v933_v10 = vpop.eup %932  ;;  %944 = vtanh.f32 %v554_v6 }
 0x280   :  { %v935_v12 = vpop.eup %934  ;;  %v696_v13 = vmul.f32 %v933_v10, %v679_v11  ;;  %946 = vtanh.f32 %v556_v9  ;;  %v559_v14 = vpop.f32.mrb[8].mxu1  ;;  %v741_v10 = vunpack.c.0.s8 %v740_v4 }
 0x281   :  { %v693_v15 = vmul.f32 %v935_v12, %v674_v8  ;;  %v560_v16 = vadd.f32 %v559_v14, %v462_v63  ;;  %v561_v17 = vpop.f32.mrb[9].mxu1  ;;  %v731_v12 = vstv %s1188_s8  ;;  %s960_s8 = scalar_lea.vmem %s774_s18, 64 }
 0x282   :  { %v562_v18 = vadd.f32 %v561_v17, %v462_v63  ;;  %v744_v17 = vsub.s32 %v741_v10, %v1104_v25  ;;  %p962_p2 = scmp.lt.s32.totalorder %s960_s8, %s956_s19 }
 0x283   :  { %v937_v19 = vpop.eup %936  ;;  %v721_v20 = vadd.f32 %v696_v13, %v693_v15  ;;  %948 = vtanh.f32 %v560_v16 }
 0x284   :  { %v939_v23 = vpop.eup %938  ;;  %950 = vtanh.f32 %v562_v18  ;;  %v565_v28 = vpop.f32.mrb[10].mxu1  ;;  %v702_v35 = vmul.f32 %v937_v19, %v689_v32  ;;  %p963_p3 = por %p962_p2, %p961_p1 }
 0x285   :  { %v699_v29 = vmul.f32 %v939_v23, %v684_v26  ;;  %v566_v30 = vadd.f32 %v565_v28, %v467_v61  ;;  %v567_v31 = vpop.f32.mrb[11].mxu1  ;;  %v941_v34 = vpop.eup %940 }
 0x286   :  { %v568_v33 = vadd.f32 %v567_v31, %v467_v61  ;;  %v943_v27 = vpop.eup %942  ;;  %v691_v40 = vmul.f32 %v941_v34, %v674_v8  ;;  %p964_p4 = pnand %p963_p3, %p957_p0 }
 0x287   :  { %v722_v36 = vadd.f32 %v721_v20, %v699_v29  ;;  %952 = vtanh.f32 %v566_v30  ;;  %v692_v42 = vmul.f32 %v943_v27, %v674_v8 }
 0x288   :  { %954 = vtanh.f32 %v568_v33 }
 0x289   :  { %v945_v37 = vpop.eup %944  ;;  %v723_v38 = vadd.f32 %v722_v36, %v702_v35 }
 0x28a   :  { %v947_v39 = vpop.eup %946  ;;  %v694_v41 = vmul.f32 %v945_v37, %v679_v11 }
 0x28b   :  { %v695_v45 = vmul.f32 %v947_v39, %v679_v11  ;;  %v724_v48 = vrot.slane %v723_v38, 4 }
 0x28c   :  { %v703_v43 = vadd.f32 %v694_v41, %v691_v40 }
 0x28d   :  { %v949_v44 = vpop.eup %948  ;;  %v712_v46 = vadd.f32 %v695_v45, %v692_v42  ;;  %v725_v51 = vadd.f32 %v724_v48, %v723_v38 }
 0x28e   :  { %v951_v47 = vpop.eup %950  ;;  %v697_v49 = vmul.f32 %v949_v44, %v684_v26 }
 0x28f   :  { %v698_v50 = vmul.f32 %v951_v47, %v684_v26  ;;  %v726_v58 = vrot.slane %v725_v51, 2 }
 0x290   :  { %v704_v52 = vadd.f32 %v703_v43, %v697_v49 }
 0x291   :  { %v953_v53 = vpop.eup %952  ;;  %v713_v54 = vadd.f32 %v712_v46, %v698_v50  ;;  %v727_v63 = vadd.f32 %v726_v58, %v725_v51 }
 0x292   :  { %v955_v55 = vpop.eup %954  ;;  %v700_v56 = vmul.f32 %v953_v53, %v689_v32 }
 0x293   :  { %v701_v57 = vmul.f32 %v955_v55, %v689_v32  ;;  %v728_v3 = vrot.slane %v727_v63, 1 }
 0x294   :  { %v705_v59 = vadd.f32 %v704_v52, %v700_v56 }
 0x295   :  { %v714_v60 = vadd.f32 %v713_v54, %v701_v57  ;;  %v729_v9 = vadd.f32 %v728_v3, %v727_v63 }
 0x296   :  { %v706_v61 = vrot.slane %v705_v59, 4 }
 0x297   :  { %v715_v62 = vrot.slane %v714_v60, 4  ;;  %v734_v16 = vadd.f32 %v731_v12, %v729_v9 }
 0x298   :  { %v707_v0 = vadd.f32 %v706_v61, %v705_v59 }
 0x299   :  { %v716_v1 = vadd.f32 %v715_v62, %v714_v60  ;;  %v752_v20 = vrot.slane %v734_v16, %v744_v17 }
 0x29a   :  { %v708_v21 = vrot.slane %v707_v0, 2 }
 0x29b   :  { %v717_v2 = vrot.slane %v716_v1, 2 }
 0x29c   :  { %v709_v5 = vadd.f32 %v708_v21, %v707_v0 }
 0x29d   :  { %v718_v6 = vadd.f32 %v717_v2, %v716_v1 }
 0x29e   :  { %v710_v7 = vrot.slane %v709_v5, 1 }
 0x29f   :  { %v719_v8 = vrot.slane %v718_v6, 1 }
 0x2a0   :  { %v711_v11 = vadd.f32 %v710_v7, %v709_v5 }
 0x2a1   :  { %v720_v13 = vadd.f32 %v719_v8, %v718_v6 }
 0x2a2   :  { %v732_v14 = vadd.f32 %v731_v12, %v711_v11 }
 0x2a3   :  { %v733_v15 = vadd.f32 %v731_v12, %v720_v13 }
 0x2a5   :  { %v738_v18 = vcombine.low %v732_v14, %v733_v15 }
 0x2a7   :  { %v745_v19 = vrot.slane %v738_v18, %v744_v17 }
 0x2a9   :  { %v753_v23 = vcombine.low %v745_v19, %v752_v20 }
 0x2ab   :  { %v760_v26 = vrot.slane %v753_v23, %v744_v17 }
 0x2ad   :  { %766 = vst.msk [vmem:[#allocation3] sm:$0x7] %vm764_vm1, %v760_v26 }
 0x2ae   :  { %967 = shalt.err (!%p964_p4)
}
 0x2af   :  { %s968_s4 = scalar_lea.hbm %s1189_s9, 48 }
 0x2b0   :  { %p969_p5 = scmp.ne.s32.totalorder %s1189_s9, %s968_s4  ;;  %p972_p6 = scmp.lt.u32.totalorder %s968_s4, %s1189_s9 }
 0x2b2   :  { %p974_p7 = pnand %p972_p6, %p969_p5 }
 0x2b4   :  { %977 = shalt.err (!%p974_p7)
}
 0x2b5   :  { %776 = dma.vmem_to_hbm [thread:$0]  %s774_s18, 48, %s1189_s9, [#allocation4]  }
 0x2b6   :  { %978 = dma.done.wait [#allocation4], 48  }
 0x2b7   :  { %979 = vsyncadd [#allocation4], 4294967248 }
 0x2b8   :  { %780 = vsyncpa [#allocation4], 1 }

</bundles_post_ra>
